<compile_context>
chip_gen: v7x
topology: tpu7x:2x2x1
jax: 0.10.0
libtpu: 0.0.40
codegen_flags: <defaults>
</compile_context>

<pallas_src>
import functools

import jax
import jax.numpy as jnp
from jax.experimental import pallas as pl
from jax.experimental.pallas import tpu as pltpu

EPS = 1e-5
DIM = 128  # padded lane width for every layer

# Order of Linear weights in w_slab / BN params in v_slab.
_LIN_ORDER = ("lin1", "rb1_lin1", "rb1_lin2", "lin2",
              "rb2_lin1", "rb2_lin2", "lin3", "lin4")
_BN_ORDER = ("bn1", "rb1_bn1", "rb1_bn2", "bn2", "rb2_bn1", "rb2_bn2", "bn3")


def pose_regressor_kernel(x_ref, w_ref, v_ref, o_ref):
    # x_ref/o_ref: (group_size, 128) after the squeezed group axis.
    x = x_ref[...].astype(jnp.float32)
    inv_n = 1.0 / x.shape[0]

    def linear(h, idx):
        # bf16 LHS x bf16 RHS -> single MXU pass, f32 accumulation.
        return jnp.dot(h.astype(jnp.bfloat16), w_ref[idx],
                       preferred_element_type=jnp.float32)

    def bn(h, bn_idx):
        # Training-mode BatchNorm1d, one-pass statistics, fused affine.
        g = v_ref[pl.ds(2 * bn_idx, 1), :]        # (1, 128) gamma (0 on pad lanes)
        be = v_ref[pl.ds(2 * bn_idx + 1, 1), :]   # (1, 128) beta  (0 on pad lanes)
        s1 = jnp.sum(h, axis=0, keepdims=True)       # independent reduction #1
        s2 = jnp.sum(h * h, axis=0, keepdims=True)   # independent reduction #2
        mu = s1 * inv_n
        var = jnp.maximum(s2 * inv_n - mu * mu, 0.0)
        s = g * jax.lax.rsqrt(var + EPS)             # fused scale (EUP rsqrt)
        return h * s + (be - mu * s)                 # offset math overlaps rsqrt

    def relu(h):
        return jnp.maximum(h, 0.0)

    # Linear(34,128) + BN(128) + ReLU   (pre-BN bias exactly cancelled by BN)
    h = relu(bn(linear(x, 0), 0))

    # ResidualBlock(128,128): identity shortcut
    r = h
    out = relu(bn(linear(h, 1), 1))
    out = bn(linear(out, 2), 2)
    h = relu(out + r)

    # Linear(128,64) + BN(64) + ReLU
    h = relu(bn(linear(h, 3), 3))

    # ResidualBlock(64,64): identity shortcut
    r = h
    out = relu(bn(linear(h, 4), 4))
    out = bn(linear(out, 5), 5)
    h = relu(out + r)

    # Linear(64,32) + BN(32) + ReLU
    h = relu(bn(linear(h, 6), 6))

    # Linear(32, output_dim) + bias (the only bias that survives BN folding)
    b4 = v_ref[pl.ds(14, 1), :]
    o_ref[...] = (linear(h, 7) + b4).astype(o_ref.dtype)


def pack_params(params):
    """Pack PyTorch-layout parameters into the two kernel slabs.

    Weights go to bf16 (single-pass MXU, half the DMA bytes); BN/bias rows stay
    f32. Pre-BN Linear biases are dropped (exact cancellation under
    training-mode BN). Padded rows/cols/lanes are zero, so padded activation
    lanes stay exactly 0 through the whole network.
    """
    def pad_w(w):  # PyTorch (out, in) -> transposed (in, out), zero-padded, bf16
        wt = w.T.astype(jnp.bfloat16)
        return jnp.zeros((DIM, DIM), jnp.bfloat16).at[
            :wt.shape[0], :wt.shape[1]].set(wt)

    def pad_v(v):
        return jnp.zeros((DIM,), jnp.float32).at[:v.shape[0]].set(
            v.astype(jnp.float32))

    w_slab = jnp.stack([pad_w(params[k]["w"]) for k in _LIN_ORDER])  # (8,128,128)

    rows = []
    for k in _BN_ORDER:
        rows.append(pad_v(params[k]["g"]))
        rows.append(pad_v(params[k]["b"]))
    rows.append(pad_v(params["lin4"]["b"]))             # row 14: final Linear bias
    rows.append(jnp.zeros((DIM,), jnp.float32))         # row 15: pad to 16 rows
    v_slab = jnp.stack(rows)                            # (16, 128)
    return w_slab, v_slab


@functools.partial(jax.jit, static_argnums=(3, 4))
def pose_regressor(x, w_slab, v_slab, output_dim, group_size=None):
    """x: (B, input_dim) f32 with B = G * group_size.

    BatchNorm statistics are computed per group of `group_size` rows (the
    default group_size=None means one group over the whole batch, i.e. the
    exact PyTorch module semantics for a single batch).
    Returns (B, output_dim) f32.
    """
    B, in_dim = x.shape
    if group_size is None:
        group_size = B
    assert B % group_size == 0
    G = B // group_size

    x_pad = jnp.zeros((G, group_size, DIM), jnp.float32).at[
        :, :, :in_dim].set(x.reshape(G, group_size, in_dim))

    out = pl.pallas_call(
        pose_regressor_kernel,
        grid=(G,),
        in_specs=[
            pl.BlockSpec((None, group_size, DIM), lambda g: (g, 0, 0)),
            # Constant index maps: both slabs DMA'd once, VMEM-resident.
            pl.BlockSpec((8, DIM, DIM), lambda g: (0, 0, 0)),
            pl.BlockSpec((16, DIM), lambda g: (0, 0)),
        ],
        out_specs=pl.BlockSpec((None, group_size, DIM), lambda g: (g, 0, 0)),
        out_shape=jax.ShapeDtypeStruct((G, group_size, DIM), jnp.float32),
        compiler_params=pltpu.CompilerParams(
            # Groups are independent (BN is per group) -> let v7x's two
            # TensorCores split them when G > 1.
            dimension_semantics=("parallel",)),
    )(x_pad, w_slab, v_slab)

    # Kernel stores lane-dense (group_size, 128) blocks; narrow slice here.
    return out.reshape(B, DIM)[:, :output_dim]


def init_params(key, input_dim=34, output_dim=8):
    """Deterministic synthetic parameters in PyTorch layout (W: (out, in))."""
    keys = iter(jax.random.split(key, 64))

    def lin(fin, fout):
        w = jax.random.normal(next(keys), (fout, fin), jnp.float32) / jnp.sqrt(
            jnp.float32(fin))
        b = 0.01 * jax.random.normal(next(keys), (fout,), jnp.float32)
        return {"w": w, "b": b}

    def bn(f):
        g = 1.0 + 0.1 * jax.random.normal(next(keys), (f,), jnp.float32)
        be = 0.1 * jax.random.normal(next(keys), (f,), jnp.float32)
        return {"g": g, "b": be}

    return {
        "lin1": lin(input_dim, 128), "bn1": bn(128),
        "rb1_lin1": lin(128, 128), "rb1_bn1": bn(128),
        "rb1_lin2": lin(128, 128), "rb1_bn2": bn(128),
        "lin2": lin(128, 64), "bn2": bn(64),
        "rb2_lin1": lin(64, 64), "rb2_bn1": bn(64),
        "rb2_lin2": lin(64, 64), "rb2_bn2": bn(64),
        "lin3": lin(64, 32), "bn3": bn(32),
        "lin4": lin(32, output_dim),
    }


def pose_regressor_ref(x, p):
    """Pure-JAX f32 reference matching the PyTorch module (training-mode BN)."""
    hi = jax.lax.Precision.HIGHEST

    def lin(h, q):
        return jnp.dot(h, q["w"].T, precision=hi) + q["b"]

    def bn(h, q):
        mu = jnp.mean(h, axis=0, keepdims=True)
        var = jnp.mean(jnp.square(h - mu), axis=0, keepdims=True)
        return (h - mu) * jax.lax.rsqrt(var + EPS) * q["g"] + q["b"]

    def relu(h):
        return jnp.maximum(h, 0.0)

    h = relu(bn(lin(x, p["lin1"]), p["bn1"]))
    r = h
    o = relu(bn(lin(h, p["rb1_lin1"]), p["rb1_bn1"]))
    o = bn(lin(o, p["rb1_lin2"]), p["rb1_bn2"])
    h = relu(o + r)
    h = relu(bn(lin(h, p["lin2"]), p["bn2"]))
    r = h
    o = relu(bn(lin(h, p["rb2_lin1"]), p["rb2_bn1"]))
    o = bn(lin(o, p["rb2_lin2"]), p["rb2_bn2"])
    h = relu(o + r)
    h = relu(bn(lin(h, p["lin3"]), p["bn3"]))
    return lin(h, p["lin4"])


if __name__ == "__main__":
    key = jax.random.PRNGKey(0)
    kx, kp = jax.random.split(key)

    B, INPUT_DIM, OUTPUT_DIM = 8, 34, 8
    x = jax.random.normal(kx, (B, INPUT_DIM), jnp.float32)
    params = init_params(kp, INPUT_DIM, OUTPUT_DIM)
    w_slab, v_slab = pack_params(params)

    out = pose_regressor(x, w_slab, v_slab, OUTPUT_DIM, B)
    jax.block_until_ready(out)
    assert out.shape == (B, OUTPUT_DIM) and out.dtype == jnp.float32

    ref = pose_regressor_ref(x, params)
    err = float(jnp.max(jnp.abs(out - ref)))
    # Tolerance absorbs bf16 weight/activation quantization over 8 layers.
    assert err < 1e-1, err
    assert not bool(jnp.any(jnp.isnan(out)))

    print("KERNEL_OK")
</pallas_src>

<mosaic_0001>
module attributes {stable_mosaic.version = 11 : i64} {
  func.func @pose_regressor_kernel(%arg0: i32, %arg1: memref<1x8x128xf32, #tpu.memory_space<vmem>>, %arg2: memref<8x128x128xbf16, #tpu.memory_space<vmem>>, %arg3: memref<16x128xf32, #tpu.memory_space<vmem>>, %arg4: memref<1x8x128xf32, #tpu.memory_space<vmem>>) attributes {dimension_semantics = [#tpu.dimension_semantics<parallel>], iteration_bounds = array<i64: 1>, scalar_prefetch = 0 : i64, scratch_operands = 0 : i64, tpu.core_type = #tpu.core_type<tc>, window_params = [{transform_indices = @transform_0, window_bounds = array<i64: 1, 8, 128>}, {pipeline_mode = #tpu.pipeline_mode<synchronous>, transform_indices = @transform_1, window_bounds = array<i64: 8, 128, 128>}, {pipeline_mode = #tpu.pipeline_mode<synchronous>, transform_indices = @transform_2, window_bounds = array<i64: 16, 128>}, {transform_indices = @transform_3, window_bounds = array<i64: 1, 8, 128>}]} {
    %c0 = arith.constant 0 : index
    %c0_0 = arith.constant 0 : index
    %c0_1 = arith.constant 0 : index
    %0 = vector.load %arg1[%c0, %c0_0, %c0_1] : memref<1x8x128xf32, #tpu.memory_space<vmem>>, vector<1x8x128xf32>
    %1 = vector.shape_cast %0 : vector<1x8x128xf32> to vector<8x128xf32>
    %2 = arith.truncf %1 : vector<8x128xf32> to vector<8x128xbf16>
    %c0_2 = arith.constant 0 : index
    %c0_3 = arith.constant 0 : index
    %c0_4 = arith.constant 0 : index
    %3 = vector.load %arg2[%c0_2, %c0_3, %c0_4] : memref<8x128x128xbf16, #tpu.memory_space<vmem>>, vector<1x128x128xbf16>
    %4 = vector.shape_cast %3 : vector<1x128x128xbf16> to vector<128x128xbf16>
    %cst = arith.constant dense<0.000000e+00> : vector<8x128xf32>
    %5 = tpu.matmul %2, %4, %cst {dimension_numbers = #tpu.dot_dimension_numbers<[1], [0], [0], [1], [0, 0, 1, 1], [], []>} : vector<8x128xbf16>, vector<128x128xbf16>, vector<8x128xf32> -> vector<8x128xf32>
    %c0_5 = arith.constant 0 : index
    %c0_6 = arith.constant 0 : index
    %6 = vector.load %arg3[%c0_5, %c0_6] : memref<16x128xf32, #tpu.memory_space<vmem>>, vector<1x128xf32>
    %c1 = arith.constant 1 : index
    %c0_7 = arith.constant 0 : index
    %7 = vector.load %arg3[%c1, %c0_7] : memref<16x128xf32, #tpu.memory_space<vmem>>, vector<1x128xf32>
    %cst_8 = arith.constant dense<0.000000e+00> : vector<128xf32>
    %8 = vector.multi_reduction <add>, %5, %cst_8 [0] : vector<8x128xf32> to vector<128xf32>
    %9 = vector.shape_cast %8 : vector<128xf32> to vector<1x128xf32>
    %10 = arith.mulf %5, %5 : vector<8x128xf32>
    %cst_9 = arith.constant dense<0.000000e+00> : vector<128xf32>
    %11 = vector.multi_reduction <add>, %10, %cst_9 [0] : vector<8x128xf32> to vector<128xf32>
    %12 = vector.shape_cast %11 : vector<128xf32> to vector<1x128xf32>
    %cst_10 = arith.constant 1.250000e-01 : f32
    %13 = vector.broadcast %cst_10 : f32 to vector<1x128xf32>
    %14 = arith.mulf %9, %13 : vector<1x128xf32>
    %cst_11 = arith.constant 1.250000e-01 : f32
    %15 = vector.broadcast %cst_11 : f32 to vector<1x128xf32>
    %16 = arith.mulf %12, %15 : vector<1x128xf32>
    %17 = arith.mulf %14, %14 : vector<1x128xf32>
    %18 = arith.subf %16, %17 : vector<1x128xf32>
    %cst_12 = arith.constant 0.000000e+00 : f32
    %19 = vector.broadcast %cst_12 : f32 to vector<1x128xf32>
    %20 = arith.maximumf %18, %19 : vector<1x128xf32>
    %cst_13 = arith.constant 9.99999974E-6 : f32
    %21 = vector.broadcast %cst_13 : f32 to vector<1x128xf32>
    %22 = arith.addf %20, %21 : vector<1x128xf32>
    %23 = math.rsqrt %22 : vector<1x128xf32>
    %24 = arith.mulf %6, %23 : vector<1x128xf32>
    %25 = vector.broadcast %24 : vector<1x128xf32> to vector<8x128xf32>
    %26 = arith.mulf %5, %25 : vector<8x128xf32>
    %27 = arith.mulf %14, %24 : vector<1x128xf32>
    %28 = arith.subf %7, %27 : vector<1x128xf32>
    %29 = vector.broadcast %28 : vector<1x128xf32> to vector<8x128xf32>
    %30 = arith.addf %26, %29 : vector<8x128xf32>
    %cst_14 = arith.constant 0.000000e+00 : f32
    %31 = vector.broadcast %cst_14 : f32 to vector<8x128xf32>
    %32 = arith.maximumf %30, %31 : vector<8x128xf32>
    %33 = arith.truncf %32 : vector<8x128xf32> to vector<8x128xbf16>
    %c1_15 = arith.constant 1 : index
    %c0_16 = arith.constant 0 : index
    %c0_17 = arith.constant 0 : index
    %34 = vector.load %arg2[%c1_15, %c0_16, %c0_17] : memref<8x128x128xbf16, #tpu.memory_space<vmem>>, vector<1x128x128xbf16>
    %35 = vector.shape_cast %34 : vector<1x128x128xbf16> to vector<128x128xbf16>
    %cst_18 = arith.constant dense<0.000000e+00> : vector<8x128xf32>
    %36 = tpu.matmul %33, %35, %cst_18 {dimension_numbers = #tpu.dot_dimension_numbers<[1], [0], [0], [1], [0, 0, 1, 1], [], []>} : vector<8x128xbf16>, vector<128x128xbf16>, vector<8x128xf32> -> vector<8x128xf32>
    %c2 = arith.constant 2 : index
    %c0_19 = arith.constant 0 : index
    %37 = vector.load %arg3[%c2, %c0_19] : memref<16x128xf32, #tpu.memory_space<vmem>>, vector<1x128xf32>
    %c3 = arith.constant 3 : index
    %c0_20 = arith.constant 0 : index
    %38 = vector.load %arg3[%c3, %c0_20] : memref<16x128xf32, #tpu.memory_space<vmem>>, vector<1x128xf32>
    %cst_21 = arith.constant dense<0.000000e+00> : vector<128xf32>
    %39 = vector.multi_reduction <add>, %36, %cst_21 [0] : vector<8x128xf32> to vector<128xf32>
    %40 = vector.shape_cast %39 : vector<128xf32> to vector<1x128xf32>
    %41 = arith.mulf %36, %36 : vector<8x128xf32>
    %cst_22 = arith.constant dense<0.000000e+00> : vector<128xf32>
    %42 = vector.multi_reduction <add>, %41, %cst_22 [0] : vector<8x128xf32> to vector<128xf32>
    %43 = vector.shape_cast %42 : vector<128xf32> to vector<1x128xf32>
    %cst_23 = arith.constant 1.250000e-01 : f32
    %44 = vector.broadcast %cst_23 : f32 to vector<1x128xf32>
    %45 = arith.mulf %40, %44 : vector<1x128xf32>
    %cst_24 = arith.constant 1.250000e-01 : f32
    %46 = vector.broadcast %cst_24 : f32 to vector<1x128xf32>
    %47 = arith.mulf %43, %46 : vector<1x128xf32>
    %48 = arith.mulf %45, %45 : vector<1x128xf32>
    %49 = arith.subf %47, %48 : vector<1x128xf32>
    %cst_25 = arith.constant 0.000000e+00 : f32
    %50 = vector.broadcast %cst_25 : f32 to vector<1x128xf32>
    %51 = arith.maximumf %49, %50 : vector<1x128xf32>
    %cst_26 = arith.constant 9.99999974E-6 : f32
    %52 = vector.broadcast %cst_26 : f32 to vector<1x128xf32>
    %53 = arith.addf %51, %52 : vector<1x128xf32>
    %54 = math.rsqrt %53 : vector<1x128xf32>
    %55 = arith.mulf %37, %54 : vector<1x128xf32>
    %56 = vector.broadcast %55 : vector<1x128xf32> to vector<8x128xf32>
    %57 = arith.mulf %36, %56 : vector<8x128xf32>
    %58 = arith.mulf %45, %55 : vector<1x128xf32>
    %59 = arith.subf %38, %58 : vector<1x128xf32>
    %60 = vector.broadcast %59 : vector<1x128xf32> to vector<8x128xf32>
    %61 = arith.addf %57, %60 : vector<8x128xf32>
    %cst_27 = arith.constant 0.000000e+00 : f32
    %62 = vector.broadcast %cst_27 : f32 to vector<8x128xf32>
    %63 = arith.maximumf %61, %62 : vector<8x128xf32>
    %64 = arith.truncf %63 : vector<8x128xf32> to vector<8x128xbf16>
    %c2_28 = arith.constant 2 : index
    %c0_29 = arith.constant 0 : index
    %c0_30 = arith.constant 0 : index
    %65 = vector.load %arg2[%c2_28, %c0_29, %c0_30] : memref<8x128x128xbf16, #tpu.memory_space<vmem>>, vector<1x128x128xbf16>
    %66 = vector.shape_cast %65 : vector<1x128x128xbf16> to vector<128x128xbf16>
    %cst_31 = arith.constant dense<0.000000e+00> : vector<8x128xf32>
    %67 = tpu.matmul %64, %66, %cst_31 {dimension_numbers = #tpu.dot_dimension_numbers<[1], [0], [0], [1], [0, 0, 1, 1], [], []>} : vector<8x128xbf16>, vector<128x128xbf16>, vector<8x128xf32> -> vector<8x128xf32>
    %c4 = arith.constant 4 : index
    %c0_32 = arith.constant 0 : index
    %68 = vector.load %arg3[%c4, %c0_32] : memref<16x128xf32, #tpu.memory_space<vmem>>, vector<1x128xf32>
    %c5 = arith.constant 5 : index
    %c0_33 = arith.constant 0 : index
    %69 = vector.load %arg3[%c5, %c0_33] : memref<16x128xf32, #tpu.memory_space<vmem>>, vector<1x128xf32>
    %cst_34 = arith.constant dense<0.000000e+00> : vector<128xf32>
    %70 = vector.multi_reduction <add>, %67, %cst_34 [0] : vector<8x128xf32> to vector<128xf32>
    %71 = vector.shape_cast %70 : vector<128xf32> to vector<1x128xf32>
    %72 = arith.mulf %67, %67 : vector<8x128xf32>
    %cst_35 = arith.constant dense<0.000000e+00> : vector<128xf32>
    %73 = vector.multi_reduction <add>, %72, %cst_35 [0] : vector<8x128xf32> to vector<128xf32>
    %74 = vector.shape_cast %73 : vector<128xf32> to vector<1x128xf32>
    %cst_36 = arith.constant 1.250000e-01 : f32
    %75 = vector.broadcast %cst_36 : f32 to vector<1x128xf32>
    %76 = arith.mulf %71, %75 : vector<1x128xf32>
    %cst_37 = arith.constant 1.250000e-01 : f32
    %77 = vector.broadcast %cst_37 : f32 to vector<1x128xf32>
    %78 = arith.mulf %74, %77 : vector<1x128xf32>
    %79 = arith.mulf %76, %76 : vector<1x128xf32>
    %80 = arith.subf %78, %79 : vector<1x128xf32>
    %cst_38 = arith.constant 0.000000e+00 : f32
    %81 = vector.broadcast %cst_38 : f32 to vector<1x128xf32>
    %82 = arith.maximumf %80, %81 : vector<1x128xf32>
    %cst_39 = arith.constant 9.99999974E-6 : f32
    %83 = vector.broadcast %cst_39 : f32 to vector<1x128xf32>
    %84 = arith.addf %82, %83 : vector<1x128xf32>
    %85 = math.rsqrt %84 : vector<1x128xf32>
    %86 = arith.mulf %68, %85 : vector<1x128xf32>
    %87 = vector.broadcast %86 : vector<1x128xf32> to vector<8x128xf32>
    %88 = arith.mulf %67, %87 : vector<8x128xf32>
    %89 = arith.mulf %76, %86 : vector<1x128xf32>
    %90 = arith.subf %69, %89 : vector<1x128xf32>
    %91 = vector.broadcast %90 : vector<1x128xf32> to vector<8x128xf32>
    %92 = arith.addf %88, %91 : vector<8x128xf32>
    %93 = arith.addf %92, %32 : vector<8x128xf32>
    %cst_40 = arith.constant 0.000000e+00 : f32
    %94 = vector.broadcast %cst_40 : f32 to vector<8x128xf32>
    %95 = arith.maximumf %93, %94 : vector<8x128xf32>
    %96 = arith.truncf %95 : vector<8x128xf32> to vector<8x128xbf16>
    %c3_41 = arith.constant 3 : index
    %c0_42 = arith.constant 0 : index
    %c0_43 = arith.constant 0 : index
    %97 = vector.load %arg2[%c3_41, %c0_42, %c0_43] : memref<8x128x128xbf16, #tpu.memory_space<vmem>>, vector<1x128x128xbf16>
    %98 = vector.shape_cast %97 : vector<1x128x128xbf16> to vector<128x128xbf16>
    %cst_44 = arith.constant dense<0.000000e+00> : vector<8x128xf32>
    %99 = tpu.matmul %96, %98, %cst_44 {dimension_numbers = #tpu.dot_dimension_numbers<[1], [0], [0], [1], [0, 0, 1, 1], [], []>} : vector<8x128xbf16>, vector<128x128xbf16>, vector<8x128xf32> -> vector<8x128xf32>
    %c6 = arith.constant 6 : index
    %c0_45 = arith.constant 0 : index
    %100 = vector.load %arg3[%c6, %c0_45] : memref<16x128xf32, #tpu.memory_space<vmem>>, vector<1x128xf32>
    %c7 = arith.constant 7 : index
    %c0_46 = arith.constant 0 : index
    %101 = vector.load %arg3[%c7, %c0_46] : memref<16x128xf32, #tpu.memory_space<vmem>>, vector<1x128xf32>
    %cst_47 = arith.constant dense<0.000000e+00> : vector<128xf32>
    %102 = vector.multi_reduction <add>, %99, %cst_47 [0] : vector<8x128xf32> to vector<128xf32>
    %103 = vector.shape_cast %102 : vector<128xf32> to vector<1x128xf32>
    %104 = arith.mulf %99, %99 : vector<8x128xf32>
    %cst_48 = arith.constant dense<0.000000e+00> : vector<128xf32>
    %105 = vector.multi_reduction <add>, %104, %cst_48 [0] : vector<8x128xf32> to vector<128xf32>
    %106 = vector.shape_cast %105 : vector<128xf32> to vector<1x128xf32>
    %cst_49 = arith.constant 1.250000e-01 : f32
    %107 = vector.broadcast %cst_49 : f32 to vector<1x128xf32>
    %108 = arith.mulf %103, %107 : vector<1x128xf32>
    %cst_50 = arith.constant 1.250000e-01 : f32
    %109 = vector.broadcast %cst_50 : f32 to vector<1x128xf32>
    %110 = arith.mulf %106, %109 : vector<1x128xf32>
    %111 = arith.mulf %108, %108 : vector<1x128xf32>
    %112 = arith.subf %110, %111 : vector<1x128xf32>
    %cst_51 = arith.constant 0.000000e+00 : f32
    %113 = vector.broadcast %cst_51 : f32 to vector<1x128xf32>
    %114 = arith.maximumf %112, %113 : vector<1x128xf32>
    %cst_52 = arith.constant 9.99999974E-6 : f32
    %115 = vector.broadcast %cst_52 : f32 to vector<1x128xf32>
    %116 = arith.addf %114, %115 : vector<1x128xf32>
    %117 = math.rsqrt %116 : vector<1x128xf32>
    %118 = arith.mulf %100, %117 : vector<1x128xf32>
    %119 = vector.broadcast %118 : vector<1x128xf32> to vector<8x128xf32>
    %120 = arith.mulf %99, %119 : vector<8x128xf32>
    %121 = arith.mulf %108, %118 : vector<1x128xf32>
    %122 = arith.subf %101, %121 : vector<1x128xf32>
    %123 = vector.broadcast %122 : vector<1x128xf32> to vector<8x128xf32>
    %124 = arith.addf %120, %123 : vector<8x128xf32>
    %cst_53 = arith.constant 0.000000e+00 : f32
    %125 = vector.broadcast %cst_53 : f32 to vector<8x128xf32>
    %126 = arith.maximumf %124, %125 : vector<8x128xf32>
    %127 = arith.truncf %126 : vector<8x128xf32> to vector<8x128xbf16>
    %c4_54 = arith.constant 4 : index
    %c0_55 = arith.constant 0 : index
    %c0_56 = arith.constant 0 : index
    %128 = vector.load %arg2[%c4_54, %c0_55, %c0_56] : memref<8x128x128xbf16, #tpu.memory_space<vmem>>, vector<1x128x128xbf16>
    %129 = vector.shape_cast %128 : vector<1x128x128xbf16> to vector<128x128xbf16>
    %cst_57 = arith.constant dense<0.000000e+00> : vector<8x128xf32>
    %130 = tpu.matmul %127, %129, %cst_57 {dimension_numbers = #tpu.dot_dimension_numbers<[1], [0], [0], [1], [0, 0, 1, 1], [], []>} : vector<8x128xbf16>, vector<128x128xbf16>, vector<8x128xf32> -> vector<8x128xf32>
    %c8 = arith.constant 8 : index
    %c0_58 = arith.constant 0 : index
    %131 = vector.load %arg3[%c8, %c0_58] : memref<16x128xf32, #tpu.memory_space<vmem>>, vector<1x128xf32>
    %c9 = arith.constant 9 : index
    %c0_59 = arith.constant 0 : index
    %132 = vector.load %arg3[%c9, %c0_59] : memref<16x128xf32, #tpu.memory_space<vmem>>, vector<1x128xf32>
    %cst_60 = arith.constant dense<0.000000e+00> : vector<128xf32>
    %133 = vector.multi_reduction <add>, %130, %cst_60 [0] : vector<8x128xf32> to vector<128xf32>
    %134 = vector.shape_cast %133 : vector<128xf32> to vector<1x128xf32>
    %135 = arith.mulf %130, %130 : vector<8x128xf32>
    %cst_61 = arith.constant dense<0.000000e+00> : vector<128xf32>
    %136 = vector.multi_reduction <add>, %135, %cst_61 [0] : vector<8x128xf32> to vector<128xf32>
    %137 = vector.shape_cast %136 : vector<128xf32> to vector<1x128xf32>
    %cst_62 = arith.constant 1.250000e-01 : f32
    %138 = vector.broadcast %cst_62 : f32 to vector<1x128xf32>
    %139 = arith.mulf %134, %138 : vector<1x128xf32>
    %cst_63 = arith.constant 1.250000e-01 : f32
    %140 = vector.broadcast %cst_63 : f32 to vector<1x128xf32>
    %141 = arith.mulf %137, %140 : vector<1x128xf32>
    %142 = arith.mulf %139, %139 : vector<1x128xf32>
    %143 = arith.subf %141, %142 : vector<1x128xf32>
    %cst_64 = arith.constant 0.000000e+00 : f32
    %144 = vector.broadcast %cst_64 : f32 to vector<1x128xf32>
    %145 = arith.maximumf %143, %144 : vector<1x128xf32>
    %cst_65 = arith.constant 9.99999974E-6 : f32
    %146 = vector.broadcast %cst_65 : f32 to vector<1x128xf32>
    %147 = arith.addf %145, %146 : vector<1x128xf32>
    %148 = math.rsqrt %147 : vector<1x128xf32>
    %149 = arith.mulf %131, %148 : vector<1x128xf32>
    %150 = vector.broadcast %149 : vector<1x128xf32> to vector<8x128xf32>
    %151 = arith.mulf %130, %150 : vector<8x128xf32>
    %152 = arith.mulf %139, %149 : vector<1x128xf32>
    %153 = arith.subf %132, %152 : vector<1x128xf32>
    %154 = vector.broadcast %153 : vector<1x128xf32> to vector<8x128xf32>
    %155 = arith.addf %151, %154 : vector<8x128xf32>
    %cst_66 = arith.constant 0.000000e+00 : f32
    %156 = vector.broadcast %cst_66 : f32 to vector<8x128xf32>
    %157 = arith.maximumf %155, %156 : vector<8x128xf32>
    %158 = arith.truncf %157 : vector<8x128xf32> to vector<8x128xbf16>
    %c5_67 = arith.constant 5 : index
    %c0_68 = arith.constant 0 : index
    %c0_69 = arith.constant 0 : index
    %159 = vector.load %arg2[%c5_67, %c0_68, %c0_69] : memref<8x128x128xbf16, #tpu.memory_space<vmem>>, vector<1x128x128xbf16>
    %160 = vector.shape_cast %159 : vector<1x128x128xbf16> to vector<128x128xbf16>
    %cst_70 = arith.constant dense<0.000000e+00> : vector<8x128xf32>
    %161 = tpu.matmul %158, %160, %cst_70 {dimension_numbers = #tpu.dot_dimension_numbers<[1], [0], [0], [1], [0, 0, 1, 1], [], []>} : vector<8x128xbf16>, vector<128x128xbf16>, vector<8x128xf32> -> vector<8x128xf32>
    %c10 = arith.constant 10 : index
    %c0_71 = arith.constant 0 : index
    %162 = vector.load %arg3[%c10, %c0_71] : memref<16x128xf32, #tpu.memory_space<vmem>>, vector<1x128xf32>
    %c11 = arith.constant 11 : index
    %c0_72 = arith.constant 0 : index
    %163 = vector.load %arg3[%c11, %c0_72] : memref<16x128xf32, #tpu.memory_space<vmem>>, vector<1x128xf32>
    %cst_73 = arith.constant dense<0.000000e+00> : vector<128xf32>
    %164 = vector.multi_reduction <add>, %161, %cst_73 [0] : vector<8x128xf32> to vector<128xf32>
    %165 = vector.shape_cast %164 : vector<128xf32> to vector<1x128xf32>
    %166 = arith.mulf %161, %161 : vector<8x128xf32>
    %cst_74 = arith.constant dense<0.000000e+00> : vector<128xf32>
    %167 = vector.multi_reduction <add>, %166, %cst_74 [0] : vector<8x128xf32> to vector<128xf32>
    %168 = vector.shape_cast %167 : vector<128xf32> to vector<1x128xf32>
    %cst_75 = arith.constant 1.250000e-01 : f32
    %169 = vector.broadcast %cst_75 : f32 to vector<1x128xf32>
    %170 = arith.mulf %165, %169 : vector<1x128xf32>
    %cst_76 = arith.constant 1.250000e-01 : f32
    %171 = vector.broadcast %cst_76 : f32 to vector<1x128xf32>
    %172 = arith.mulf %168, %171 : vector<1x128xf32>
    %173 = arith.mulf %170, %170 : vector<1x128xf32>
    %174 = arith.subf %172, %173 : vector<1x128xf32>
    %cst_77 = arith.constant 0.000000e+00 : f32
    %175 = vector.broadcast %cst_77 : f32 to vector<1x128xf32>
    %176 = arith.maximumf %174, %175 : vector<1x128xf32>
    %cst_78 = arith.constant 9.99999974E-6 : f32
    %177 = vector.broadcast %cst_78 : f32 to vector<1x128xf32>
    %178 = arith.addf %176, %177 : vector<1x128xf32>
    %179 = math.rsqrt %178 : vector<1x128xf32>
    %180 = arith.mulf %162, %179 : vector<1x128xf32>
    %181 = vector.broadcast %180 : vector<1x128xf32> to vector<8x128xf32>
    %182 = arith.mulf %161, %181 : vector<8x128xf32>
    %183 = arith.mulf %170, %180 : vector<1x128xf32>
    %184 = arith.subf %163, %183 : vector<1x128xf32>
    %185 = vector.broadcast %184 : vector<1x128xf32> to vector<8x128xf32>
    %186 = arith.addf %182, %185 : vector<8x128xf32>
    %187 = arith.addf %186, %126 : vector<8x128xf32>
    %cst_79 = arith.constant 0.000000e+00 : f32
    %188 = vector.broadcast %cst_79 : f32 to vector<8x128xf32>
    %189 = arith.maximumf %187, %188 : vector<8x128xf32>
    %190 = arith.truncf %189 : vector<8x128xf32> to vector<8x128xbf16>
    %c6_80 = arith.constant 6 : index
    %c0_81 = arith.constant 0 : index
    %c0_82 = arith.constant 0 : index
    %191 = vector.load %arg2[%c6_80, %c0_81, %c0_82] : memref<8x128x128xbf16, #tpu.memory_space<vmem>>, vector<1x128x128xbf16>
    %192 = vector.shape_cast %191 : vector<1x128x128xbf16> to vector<128x128xbf16>
    %cst_83 = arith.constant dense<0.000000e+00> : vector<8x128xf32>
    %193 = tpu.matmul %190, %192, %cst_83 {dimension_numbers = #tpu.dot_dimension_numbers<[1], [0], [0], [1], [0, 0, 1, 1], [], []>} : vector<8x128xbf16>, vector<128x128xbf16>, vector<8x128xf32> -> vector<8x128xf32>
    %c12 = arith.constant 12 : index
    %c0_84 = arith.constant 0 : index
    %194 = vector.load %arg3[%c12, %c0_84] : memref<16x128xf32, #tpu.memory_space<vmem>>, vector<1x128xf32>
    %c13 = arith.constant 13 : index
    %c0_85 = arith.constant 0 : index
    %195 = vector.load %arg3[%c13, %c0_85] : memref<16x128xf32, #tpu.memory_space<vmem>>, vector<1x128xf32>
    %cst_86 = arith.constant dense<0.000000e+00> : vector<128xf32>
    %196 = vector.multi_reduction <add>, %193, %cst_86 [0] : vector<8x128xf32> to vector<128xf32>
    %197 = vector.shape_cast %196 : vector<128xf32> to vector<1x128xf32>
    %198 = arith.mulf %193, %193 : vector<8x128xf32>
    %cst_87 = arith.constant dense<0.000000e+00> : vector<128xf32>
    %199 = vector.multi_reduction <add>, %198, %cst_87 [0] : vector<8x128xf32> to vector<128xf32>
    %200 = vector.shape_cast %199 : vector<128xf32> to vector<1x128xf32>
    %cst_88 = arith.constant 1.250000e-01 : f32
    %201 = vector.broadcast %cst_88 : f32 to vector<1x128xf32>
    %202 = arith.mulf %197, %201 : vector<1x128xf32>
    %cst_89 = arith.constant 1.250000e-01 : f32
    %203 = vector.broadcast %cst_89 : f32 to vector<1x128xf32>
    %204 = arith.mulf %200, %203 : vector<1x128xf32>
    %205 = arith.mulf %202, %202 : vector<1x128xf32>
    %206 = arith.subf %204, %205 : vector<1x128xf32>
    %cst_90 = arith.constant 0.000000e+00 : f32
    %207 = vector.broadcast %cst_90 : f32 to vector<1x128xf32>
    %208 = arith.maximumf %206, %207 : vector<1x128xf32>
    %cst_91 = arith.constant 9.99999974E-6 : f32
    %209 = vector.broadcast %cst_91 : f32 to vector<1x128xf32>
    %210 = arith.addf %208, %209 : vector<1x128xf32>
    %211 = math.rsqrt %210 : vector<1x128xf32>
    %212 = arith.mulf %194, %211 : vector<1x128xf32>
    %213 = vector.broadcast %212 : vector<1x128xf32> to vector<8x128xf32>
    %214 = arith.mulf %193, %213 : vector<8x128xf32>
    %215 = arith.mulf %202, %212 : vector<1x128xf32>
    %216 = arith.subf %195, %215 : vector<1x128xf32>
    %217 = vector.broadcast %216 : vector<1x128xf32> to vector<8x128xf32>
    %218 = arith.addf %214, %217 : vector<8x128xf32>
    %cst_92 = arith.constant 0.000000e+00 : f32
    %219 = vector.broadcast %cst_92 : f32 to vector<8x128xf32>
    %220 = arith.maximumf %218, %219 : vector<8x128xf32>
    %c14 = arith.constant 14 : index
    %c0_93 = arith.constant 0 : index
    %221 = vector.load %arg3[%c14, %c0_93] : memref<16x128xf32, #tpu.memory_space<vmem>>, vector<1x128xf32>
    %222 = arith.truncf %220 : vector<8x128xf32> to vector<8x128xbf16>
    %c7_94 = arith.constant 7 : index
    %c0_95 = arith.constant 0 : index
    %c0_96 = arith.constant 0 : index
    %223 = vector.load %arg2[%c7_94, %c0_95, %c0_96] : memref<8x128x128xbf16, #tpu.memory_space<vmem>>, vector<1x128x128xbf16>
    %224 = vector.shape_cast %223 : vector<1x128x128xbf16> to vector<128x128xbf16>
    %cst_97 = arith.constant dense<0.000000e+00> : vector<8x128xf32>
    %225 = tpu.matmul %222, %224, %cst_97 {dimension_numbers = #tpu.dot_dimension_numbers<[1], [0], [0], [1], [0, 0, 1, 1], [], []>} : vector<8x128xbf16>, vector<128x128xbf16>, vector<8x128xf32> -> vector<8x128xf32>
    %226 = vector.broadcast %221 : vector<1x128xf32> to vector<8x128xf32>
    %227 = arith.addf %225, %226 : vector<8x128xf32>
    %c0_98 = arith.constant 0 : index
    %c0_99 = arith.constant 0 : index
    %c0_100 = arith.constant 0 : index
    %228 = vector.load %arg4[%c0_98, %c0_99, %c0_100] : memref<1x8x128xf32, #tpu.memory_space<vmem>>, vector<1x8x128xf32>
    %229 = vector.shape_cast %228 : vector<1x8x128xf32> to vector<8x128xf32>
    %230 = vector.shape_cast %227 : vector<8x128xf32> to vector<1x8x128xf32>
    tpu.vector_store %arg4[%c0_98, %c0_99, %c0_100], %230 {strides = array<i32>} : memref<1x8x128xf32, #tpu.memory_space<vmem>>, vector<1x8x128xf32>,
    return
  }
  func.func @transform_0(%arg0: i32) -> (i32, i32, i32) {
    %c0_i32 = arith.constant 0 : i32
    %c0_i32_0 = arith.constant 0 : i32
    %c0_i32_1 = arith.constant 0 : i32
    return %arg0, %c0_i32, %c0_i32_0 : i32, i32, i32
  }
  func.func @transform_1(%arg0: i32) -> (i32, i32, i32) {
    %c0_i32 = arith.constant 0 : i32
    %c0_i32_0 = arith.constant 0 : i32
    %c0_i32_1 = arith.constant 0 : i32
    %c0_i32_2 = arith.constant 0 : i32
    return %c0_i32, %c0_i32_0, %c0_i32_1 : i32, i32, i32
  }
  func.func @transform_2(%arg0: i32) -> (i32, i32) {
    %c0_i32 = arith.constant 0 : i32
    %c0_i32_0 = arith.constant 0 : i32
    %c0_i32_1 = arith.constant 0 : i32
    return %c0_i32, %c0_i32_0 : i32, i32
  }
  func.func @transform_3(%arg0: i32) -> (i32, i32, i32) {
    %c0_i32 = arith.constant 0 : i32
    %c0_i32_0 = arith.constant 0 : i32
    %c0_i32_1 = arith.constant 0 : i32
    return %arg0, %c0_i32, %c0_i32_0 : i32, i32, i32
  }
}

</mosaic_0001>

<bundles_post_ra>
// kernel: pose_regressor.1
= control target key start
LH: loop header
LB: loop body
LE: loop exit
PB: predicated region body
PF: predicated region fallthrough
CT: control target
= control target key end

     0   :  { %8 = vsyncpa [#allocation3], 0  ;;  %s1786_s0 = inlined_call_operand.vmem [shape: f32[1,8,128], index: 0, kind: input, shape index: {}]   ;;  %s1787_s1 = inlined_call_operand.hbm [shape: bf16[8,128,128], index: 1, kind: input, shape index: {}]   ;;  %s1788_s2 = inlined_call_operand.vmem [shape: f32[16,128], index: 2, kind: input, shape index: {}]   ;;  %s1789_s3 = inlined_call_operand.hbm [shape: f32[1,8,128], index: 3, kind: output, shape index: {}]  }
   0x1   :  { %9 = vsyncpa [#allocation4], 0  ;;  %s1582_s12 = smov [#allocation2]   ;;  %s1534_s16 = scalar_lea.hbm %s1787_s1, 8192 }
   0x2   :  { %s17_s13 = sshll.u32 %s1582_s12, 4  ;;  %p1535_p0 = scmp.ne.s32.totalorder %s1787_s1, %s1534_s16  ;;  %s18_s13 = int_to_ptr.vmem [resolvable:$true] %s17_s13 }
   0x3   :  { %p1538_p1 = scmp.lt.u32.totalorder %s1534_s16, %s1787_s1 }
   0x5   :  { %p1540_p2 = pnand %p1538_p1, %p1535_p0 }
   0x7   :  { %1543 = shalt.err (!%p1540_p2)
}
   0x8   :  { %s1544_s21 = scalar_lea.vmem %s18_s13, 8192  ;;  %p1549_p4 = scmp.lt.s32.totalorder %s18_s13, %s18_s13 }
   0x9   :  { %p1545_p3 = scmp.ne.s32.totalorder %s18_s13, %s1544_s21  ;;  %p1550_p5 = scmp.lt.s32.totalorder %s1544_s21, %s1544_s21 }
   0xb   :  { %p1551_p6 = por %p1550_p5, %p1549_p4 }
   0xd   :  { %p1552_p7 = pnand %p1551_p6, %p1545_p3 }
   0xf   :  { %1555 = shalt.err (!%p1552_p7)
}
  0x10   :  { %s1583_s22 = smov 64   ;;  %s1584_s23 = smov 4  }
  0x11   :  { %23 = dma.hbm_to_vmem [thread:$0]  %s1787_s1, 8192, %s18_s13, [#allocation3], %s1583_s22, %s1583_s22, %s1584_s23  }
  0x12   :  { %1578 = dma.done.wait [#allocation3], 8192  }
  0x13   :  { %1579 = vsyncadd [#allocation3], 4294959104  ;;  %v1585_v0 = vmov 0.0   ;;  %vm1586_vm0 = vmmov 0   ;;  %v1456_v1 = vld [vmem:[#allocation2] sm:$0xff]   ;;  %v1457_v2 = vld [vmem:[#allocation2 + $0x8] sm:$0xff]   ;;  %v159_v42 = vlaneseq }
  0x14   :  { %1290 = vmatprep.subr.bf16.mxu0 %v1585_v0  ;;  %1306 = vmatprep.mubr.msk.bf16.mxu0 %vm1586_vm0, %v1585_v0  ;;  %v1458_v3 = vld [vmem:[#allocation2 + $0x10] sm:$0xff]   ;;  %v1459_v4 = vld [vmem:[#allocation2 + $0x18] sm:$0xff]   ;;  %v1460_v5 = vld [vmem:[#allocation2 + $0x20] sm:$0xff]   ;;  %s1587_s27 = smov [#allocation5]  }
  0x15   :  { %1310 = vmatprep.subr.bf16.mxu1 %v1585_v0  ;;  %1326 = vmatprep.mubr.msk.bf16.mxu1 %vm1586_vm0, %v1585_v0  ;;  %v1461_v6 = vld [vmem:[#allocation2 + $0x28] sm:$0xff]   ;;  %v1462_v7 = vld [vmem:[#allocation2 + $0x30] sm:$0xff]   ;;  %v1463_v8 = vld [vmem:[#allocation2 + $0x38] sm:$0xff]   ;;  %v160_v43 = vshrl.u32 %v159_v42, 7  ;;  %s1144_s28 = sshll.u32 %s1587_s27, 4  ;;  %s1145_s28 = int_to_ptr.vmem [resolvable:$true] %s1144_s28 }
  0x16   :  { %1291 = vmatpush3.bf16.msra.mxu0 %v1456_v1  ;;  %v30_v9 = vld [vmem:[%s1786_s0] sm:$0xff]  ;;  %v1465_v12 = vld [vmem:[#allocation2 + $0x48] sm:$0xff]   ;;  %v1466_v13 = vld [vmem:[#allocation2 + $0x50] sm:$0xff]   ;;  %s1556_s29 = scalar_lea.vmem %s1145_s28, 128  ;;  %p1561_p9 = scmp.lt.s32.totalorder %s1145_s28, %s1145_s28 }
  0x17   :  { %1292 = vmatprep.subr.bf16.mxu0 %v1585_v0  ;;  %v31_v10 = vpack.c.bf16 %v30_v9, %v30_v9  ;;  %v1464_v11 = vld [vmem:[#allocation2 + $0x40] sm:$0xff]   ;;  %v1467_v14 = vld [vmem:[#allocation2 + $0x58] sm:$0xff]   ;;  %v1469_v16 = vld [vmem:[#allocation2 + $0x68] sm:$0xff]   ;;  %v1650_v45 = vsub.s32 0, %v160_v43  ;;  %p1557_p8 = scmp.ne.s32.totalorder %s1145_s28, %s1556_s29  ;;  %p1562_p10 = scmp.lt.s32.totalorder %s1556_s29, %s1556_s29 }
  0x18   :  { %1311 = vmatpush3.bf16.msra.mxu1 %v1464_v11  ;;  %v1468_v15 = vld [vmem:[#allocation2 + $0x60] sm:$0xff]   ;;  %v1470_v17 = vld [vmem:[#allocation2 + $0x70] sm:$0xff]   ;;  %v1471_v18 = vld [vmem:[#allocation2 + $0x78] sm:$0xff]  }
  0x19   :  { %1312 = vmatprep.subr.bf16.mxu1 %v1585_v0  ;;  %v136_v44 = vld [vmem:[%s1788_s2] sm:$0x1]  ;;  %v137_v48 = vld [vmem:[%s1788_s2 + $0x1] sm:$0x1]  ;;  %v1473_v58 = vld [vmem:[#allocation2 + $0x88] sm:$0xff]   ;;  %p1563_p11 = por %p1562_p10, %p1561_p9 }
  0x1a   :  { %1293 = vmatpush3.bf16.msra.mxu0 %v1457_v2  ;;  %v1472_v57 = vld [vmem:[#allocation2 + $0x80] sm:$0xff]   ;;  %v1474_v59 = vld [vmem:[#allocation2 + $0x90] sm:$0xff]   ;;  %v1475_v60 = vld [vmem:[#allocation2 + $0x98] sm:$0xff]  }
  0x1b   :  { %1294 = vmatprep.subr.bf16.mxu0 %v1585_v0  ;;  %v1476_v61 = vld [vmem:[#allocation2 + $0xa0] sm:$0xff]   ;;  %v1477_v62 = vld [vmem:[#allocation2 + $0xa8] sm:$0xff]   ;;  %v1478_v63 = vld [vmem:[#allocation2 + $0xb0] sm:$0xff]   ;;  %p1564_p12 = pnand %p1563_p11, %p1557_p8 }
  0x1c   :  { %1313 = vmatpush3.bf16.msra.mxu1 %v1465_v12  ;;  %v1479_v1 = vld [vmem:[#allocation2 + $0xb8] sm:$0xff]   ;;  %v1485_v42 = vld [vmem:[#allocation2 + $0xe8] sm:$0xff]   ;;  %v1486_v43 = vld [vmem:[#allocation2 + $0xf0] sm:$0xff]  }
  0x1d   :  { %1314 = vmatprep.subr.bf16.mxu1 %v1585_v0 }
  0x1e   :  { %1295 = vmatpush3.bf16.msra.mxu0 %v1458_v3 }
  0x1f   :  { %1296 = vmatprep.subr.bf16.mxu0 %v1585_v0 }
  0x20   :  { %1315 = vmatpush3.bf16.msra.mxu1 %v1466_v13 }
  0x21   :  { %1316 = vmatprep.subr.bf16.mxu1 %v1585_v0 }
  0x22   :  { %1297 = vmatpush3.bf16.msra.mxu0 %v1459_v4 }
  0x23   :  { %1298 = vmatprep.subr.bf16.mxu0 %v1585_v0 }
  0x24   :  { %1317 = vmatpush3.bf16.msra.mxu1 %v1467_v14 }
  0x25   :  { %1318 = vmatprep.subr.bf16.mxu1 %v1585_v0 }
  0x26   :  { %1299 = vmatpush3.bf16.msra.mxu0 %v1460_v5 }
  0x27   :  { %1300 = vmatprep.subr.bf16.mxu0 %v1585_v0 }
  0x28   :  { %1319 = vmatpush3.bf16.msra.mxu1 %v1468_v15 }
  0x29   :  { %1320 = vmatprep.subr.bf16.mxu1 %v1585_v0 }
  0x2a   :  { %1301 = vmatpush3.bf16.msra.mxu0 %v1461_v6 }
  0x2b   :  { %1302 = vmatprep.subr.bf16.mxu0 %v1585_v0 }
  0x2c   :  { %1321 = vmatpush3.bf16.msra.mxu1 %v1469_v16 }
  0x2d   :  { %1322 = vmatprep.subr.bf16.mxu1 %v1585_v0 }
  0x2e   :  { %1303 = vmatpush3.bf16.msra.mxu0 %v1462_v7 }
  0x2f   :  { %1304 = vmatprep.subr.bf16.mxu0 %v1585_v0 }
  0x30   :  { %1323 = vmatpush3.bf16.msra.mxu1 %v1470_v17 }
  0x31   :  { %1324 = vmatprep.subr.bf16.mxu1 %v1585_v0 }
  0x32   :  { %1305 = vmatpush3.bf16.msra.mxu0 %v1463_v8 }
  0x33   :  { %1330 = vmatprep.subr.bf16.mxu0 %v1585_v0 }
  0x34   :  { %1325 = vmatpush3.bf16.msra.mxu1 %v1471_v18 }
  0x35   :  { %1307 = vmatmul.mubr.bf16.vlgmr.msra.gmra.mrb[0].mxu0 %v31_v10  ;;  %1350 = vmatprep.subr.bf16.mxu1 %v1585_v0 }
  0x36   :  { %1346 = vmatprep.mubr.msk.bf16.mxu0 %vm1586_vm0, %v1585_v0  ;;  %1331 = vmatpush3.bf16.msra.mxu0 %v1472_v57 }
  0x37   :  { %1332 = vmatprep.subr.bf16.mxu0 %v1585_v0 }
  0x3a   :  { %1333 = vmatpush3.bf16.msra.mxu0 %v1473_v58 }
  0x3b   :  { %1334 = vmatprep.subr.bf16.mxu0 %v1585_v0 }
  0x3e   :  { %1335 = vmatpush3.bf16.msra.mxu0 %v1474_v59 }
  0x3f   :  { %1336 = vmatprep.subr.bf16.mxu0 %v1585_v0 }
  0x42   :  { %1337 = vmatpush3.bf16.msra.mxu0 %v1475_v60 }
  0x43   :  { %1338 = vmatprep.subr.bf16.mxu0 %v1585_v0 }
  0x46   :  { %1339 = vmatpush3.bf16.msra.mxu0 %v1476_v61 }
  0x47   :  { %1340 = vmatprep.subr.bf16.mxu0 %v1585_v0 }
  0x4a   :  { %1341 = vmatpush3.bf16.msra.mxu0 %v1477_v62 }
  0x4b   :  { %1342 = vmatprep.subr.bf16.mxu0 %v1585_v0 }
  0x4e   :  { %1343 = vmatpush3.bf16.msra.mxu0 %v1478_v63 }
  0x4f   :  { %1344 = vmatprep.subr.bf16.mxu0 %v1585_v0 }
  0x52   :  { %1345 = vmatpush3.bf16.msra.mxu0 %v1479_v1 }
  0x53   :  { %1370 = vmatprep.subr.bf16.mxu0 %v1585_v0 }
 0x108   :  { %v130_v19 = vpop.f32.mrb[0].mxu0 }
 0x109   :  { %v138_v20 = vrot.slane %v130_v19, 4  ;;  %v144_v21 = vmul.f32 %v130_v19, %v130_v19  ;;  %v1308_v22 = vpop.f32.mrb[1].mxu0 }
 0x10a   :  { %v133_v23 = vpop.f32.mrb[2].mxu0 }
 0x10b   :  { %v139_v24 = vadd.f32 %v138_v20, %v130_v19  ;;  %v145_v25 = vrot.slane %v144_v21, 4  ;;  %v1309_v26 = vpop.f32.mrb[3].mxu0 }
 0x10d   :  { %v140_v27 = vrot.slane %v139_v24, 2  ;;  %v146_v28 = vadd.f32 %v145_v25, %v144_v21  ;;  %v278_v25 = vld [vmem:[%s1788_s2 + $0x2] sm:$0x1] }
 0x10f   :  { %v141_v29 = vadd.f32 %v140_v27, %v139_v24  ;;  %v147_v30 = vrot.slane %v146_v28, 2 }
 0x111   :  { %v142_v31 = vrot.slane %v141_v29, 1  ;;  %v148_v32 = vadd.f32 %v147_v30, %v146_v28  ;;  %v279_v28 = vld [vmem:[%s1788_s2 + $0x3] sm:$0x1] }
 0x113   :  { %v143_v33 = vadd.f32 %v142_v31, %v141_v29  ;;  %v149_v34 = vrot.slane %v148_v32, 1 }
 0x115   :  { %v150_v35 = vadd.f32 %v149_v34, %v148_v32  ;;  %v151_v36 = vmul.f32 0.125, %v143_v33 }
 0x117   :  { %v152_v37 = vmul.f32 0.125, %v150_v35  ;;  %v153_v38 = vmul.f32 %v151_v36, %v151_v36 }
 0x119   :  { %v154_v39 = vsub.f32 %v152_v37, %v153_v38  ;;  %v1480_v37 = vld [vmem:[#allocation2 + $0xc0] sm:$0xff]   ;;  %v1481_v38 = vld [vmem:[#allocation2 + $0xc8] sm:$0xff]  }
 0x11b   :  { %v155_v40 = vmax.f32 %v154_v39, 0.0  ;;  %v1482_v39 = vld [vmem:[#allocation2 + $0xd0] sm:$0xff]  }
 0x11d   :  { %v156_v41 = vadd.f32 1e-05, %v155_v40  ;;  %v1483_v40 = vld [vmem:[#allocation2 + $0xd8] sm:$0xff]  }
 0x11f   :  { %1520 = vrsqrt.f32 %v156_v41  ;;  %v1484_v41 = vld [vmem:[#allocation2 + $0xe0] sm:$0xff]  }
 0x129   :  { %v1521_v46 = vpop.eup %1520 }
 0x12a   :  { %v158_v47 = vmul.f32 %v1521_v46, %v136_v44  ;;  %v1487_v44 = vld [vmem:[#allocation2 + $0xf8] sm:$0xff]  }
 0x12c   :  { %v162_v49 = vrot.slane %v158_v47, %v1650_v45  ;;  %v164_v50 = vmul.f32 %v158_v47, %v151_v36 }
 0x12e   :  { %v165_v51 = vsub.f32 %v137_v48, %v164_v50  ;;  %v163_v52 = vmul.f32 %v162_v49, %v130_v19 }
 0x130   :  { %v169_v53 = vrot.slane %v165_v51, %v1650_v45 }
 0x132   :  { %v170_v54 = vadd.f32 %v169_v53, %v163_v52 }
 0x134   :  { %v1657_v55 = vmax.f32 %v170_v54, 0.0 }
 0x136   :  { %v172_v56 = vpack.c.bf16 %v1657_v55, %v1657_v55 }
 0x138   :  { %1327 = vmatmul.mubr.bf16.vlgmr.msra.gmra.mrb[0].mxu1 %v172_v56 }
 0x139   :  { %1366 = vmatprep.mubr.msk.bf16.mxu1 %vm1586_vm0, %v1585_v0  ;;  %1351 = vmatpush3.bf16.msra.mxu1 %v1480_v37 }
 0x13a   :  { %1352 = vmatprep.subr.bf16.mxu1 %v1585_v0 }
 0x13d   :  { %1353 = vmatpush3.bf16.msra.mxu1 %v1481_v38 }
 0x13e   :  { %1354 = vmatprep.subr.bf16.mxu1 %v1585_v0 }
 0x141   :  { %1355 = vmatpush3.bf16.msra.mxu1 %v1482_v39 }
 0x142   :  { %1356 = vmatprep.subr.bf16.mxu1 %v1585_v0 }
 0x145   :  { %1357 = vmatpush3.bf16.msra.mxu1 %v1483_v40 }
 0x146   :  { %1358 = vmatprep.subr.bf16.mxu1 %v1585_v0 }
 0x149   :  { %1359 = vmatpush3.bf16.msra.mxu1 %v1484_v41 }
 0x14a   :  { %1360 = vmatprep.subr.bf16.mxu1 %v1585_v0 }
 0x14d   :  { %1361 = vmatpush3.bf16.msra.mxu1 %v1485_v42 }
 0x14e   :  { %1362 = vmatprep.subr.bf16.mxu1 %v1585_v0 }
 0x151   :  { %1363 = vmatpush3.bf16.msra.mxu1 %v1486_v43 }
 0x152   :  { %1364 = vmatprep.subr.bf16.mxu1 %v1585_v0 }
 0x155   :  { %1365 = vmatpush3.bf16.msra.mxu1 %v1487_v44 }
 0x156   :  { %1390 = vmatprep.subr.bf16.mxu1 %v1585_v0 }
 0x20b   :  { %v272_v2 = vpop.f32.mrb[0].mxu1 }
 0x20c   :  { %v280_v3 = vrot.slane %v272_v2, 4  ;;  %v286_v4 = vmul.f32 %v272_v2, %v272_v2  ;;  %v1328_v5 = vpop.f32.mrb[1].mxu1 }
 0x20d   :  { %v275_v6 = vpop.f32.mrb[2].mxu1 }
 0x20e   :  { %v281_v7 = vadd.f32 %v280_v3, %v272_v2  ;;  %v287_v8 = vrot.slane %v286_v4, 4  ;;  %v1329_v9 = vpop.f32.mrb[3].mxu1 }
 0x210   :  { %v282_v10 = vrot.slane %v281_v7, 2  ;;  %v288_v11 = vadd.f32 %v287_v8, %v286_v4 }
 0x212   :  { %v283_v12 = vadd.f32 %v282_v10, %v281_v7  ;;  %v289_v13 = vrot.slane %v288_v11, 2  ;;  %v420_v7 = vld [vmem:[%s1788_s2 + $0x4] sm:$0x1]  ;;  %v421_v10 = vld [vmem:[%s1788_s2 + $0x5] sm:$0x1] }
 0x214   :  { %v284_v14 = vrot.slane %v283_v12, 1  ;;  %v290_v15 = vadd.f32 %v289_v13, %v288_v11 }
 0x216   :  { %v285_v16 = vadd.f32 %v284_v14, %v283_v12  ;;  %v291_v17 = vrot.slane %v290_v15, 1 }
 0x218   :  { %v292_v18 = vadd.f32 %v291_v17, %v290_v15  ;;  %v293_v19 = vmul.f32 0.125, %v285_v16 }
 0x21a   :  { %v294_v20 = vmul.f32 0.125, %v292_v18  ;;  %v295_v21 = vmul.f32 %v293_v19, %v293_v19 }
 0x21c   :  { %v296_v22 = vsub.f32 %v294_v20, %v295_v21  ;;  %v1488_v20 = vld [vmem:[#allocation2 + $0x100] sm:$0xff]   ;;  %v1489_v21 = vld [vmem:[#allocation2 + $0x108] sm:$0xff]  }
 0x21e   :  { %v297_v23 = vmax.f32 %v296_v22, 0.0  ;;  %v1490_v22 = vld [vmem:[#allocation2 + $0x110] sm:$0xff]  }
 0x220   :  { %v298_v24 = vadd.f32 1e-05, %v297_v23  ;;  %v1491_v23 = vld [vmem:[#allocation2 + $0x118] sm:$0xff]  }
 0x222   :  { %1522 = vrsqrt.f32 %v298_v24  ;;  %v1493_v24 = vld [vmem:[#allocation2 + $0x128] sm:$0xff]  }
 0x22c   :  { %v1523_v26 = vpop.eup %1522 }
 0x22d   :  { %v300_v27 = vmul.f32 %v1523_v26, %v278_v25  ;;  %v1494_v25 = vld [vmem:[#allocation2 + $0x130] sm:$0xff]   ;;  %v1495_v26 = vld [vmem:[#allocation2 + $0x138] sm:$0xff]  }
 0x22f   :  { %v304_v29 = vrot.slane %v300_v27, %v1650_v45  ;;  %v306_v30 = vmul.f32 %v300_v27, %v293_v19 }
 0x231   :  { %v307_v31 = vsub.f32 %v279_v28, %v306_v30  ;;  %v305_v32 = vmul.f32 %v304_v29, %v272_v2 }
 0x233   :  { %v311_v33 = vrot.slane %v307_v31, %v1650_v45 }
 0x235   :  { %v312_v34 = vadd.f32 %v311_v33, %v305_v32 }
 0x237   :  { %v313_v35 = vmax.f32 %v312_v34, 0.0 }
 0x239   :  { %v314_v36 = vpack.c.bf16 %v313_v35, %v313_v35 }
 0x23b   :  { %1347 = vmatmul.mubr.bf16.vlgmr.msra.gmra.mrb[4].mxu0 %v314_v36 }
 0x23c   :  { %1386 = vmatprep.mubr.msk.bf16.mxu0 %vm1586_vm0, %v1585_v0  ;;  %1371 = vmatpush3.bf16.msra.mxu0 %v1488_v20 }
 0x23d   :  { %1372 = vmatprep.subr.bf16.mxu0 %v1585_v0 }
 0x240   :  { %1373 = vmatpush3.bf16.msra.mxu0 %v1489_v21 }
 0x241   :  { %1374 = vmatprep.subr.bf16.mxu0 %v1585_v0 }
 0x244   :  { %1375 = vmatpush3.bf16.msra.mxu0 %v1490_v22 }
 0x245   :  { %1376 = vmatprep.subr.bf16.mxu0 %v1585_v0 }
 0x248   :  { %1377 = vmatpush3.bf16.msra.mxu0 %v1491_v23 }
 0x249   :  { %1378 = vmatprep.subr.bf16.mxu0 %v1585_v0 }
 0x30e   :  { %v414_v46 = vpop.f32.mrb[4].mxu0 }
 0x30f   :  { %v422_v47 = vrot.slane %v414_v46, 4  ;;  %v428_v48 = vmul.f32 %v414_v46, %v414_v46  ;;  %v1348_v49 = vpop.f32.mrb[5].mxu0 }
 0x310   :  { %v417_v50 = vpop.f32.mrb[6].mxu0 }
 0x311   :  { %v423_v51 = vadd.f32 %v422_v47, %v414_v46  ;;  %v429_v52 = vrot.slane %v428_v48, 4  ;;  %v1349_v53 = vpop.f32.mrb[7].mxu0 }
 0x313   :  { %v424_v54 = vrot.slane %v423_v51, 2  ;;  %v430_v56 = vadd.f32 %v429_v52, %v428_v48 }
 0x315   :  { %v425_v57 = vadd.f32 %v424_v54, %v423_v51  ;;  %v431_v58 = vrot.slane %v430_v56, 2  ;;  %v563_v51 = vld [vmem:[%s1788_s2 + $0x6] sm:$0x1]  ;;  %v564_v54 = vld [vmem:[%s1788_s2 + $0x7] sm:$0x1] }
 0x317   :  { %v426_v59 = vrot.slane %v425_v57, 1  ;;  %v432_v60 = vadd.f32 %v431_v58, %v430_v56 }
 0x319   :  { %v427_v61 = vadd.f32 %v426_v59, %v425_v57  ;;  %v433_v62 = vrot.slane %v432_v60, 1 }
 0x31b   :  { %v434_v63 = vadd.f32 %v433_v62, %v432_v60  ;;  %v435_v1 = vmul.f32 0.125, %v427_v61 }
 0x31d   :  { %v436_v2 = vmul.f32 0.125, %v434_v63  ;;  %v437_v3 = vmul.f32 %v435_v1, %v435_v1 }
 0x31f   :  { %v438_v4 = vsub.f32 %v436_v2, %v437_v3  ;;  %v1497_v2 = vld [vmem:[#allocation2 + $0x148] sm:$0xff]   ;;  %v1498_v3 = vld [vmem:[#allocation2 + $0x150] sm:$0xff]  }
 0x321   :  { %v439_v5 = vmax.f32 %v438_v4, 0.0  ;;  %v1499_v4 = vld [vmem:[#allocation2 + $0x158] sm:$0xff]  }
 0x323   :  { %v440_v6 = vadd.f32 1e-05, %v439_v5  ;;  %v1500_v5 = vld [vmem:[#allocation2 + $0x160] sm:$0xff]  }
 0x325   :  { %1524 = vrsqrt.f32 %v440_v6  ;;  %v1501_v6 = vld [vmem:[#allocation2 + $0x168] sm:$0xff]  }
 0x32f   :  { %v1525_v8 = vpop.eup %1524 }
 0x330   :  { %v442_v9 = vmul.f32 %v1525_v8, %v420_v7  ;;  %v1502_v7 = vld [vmem:[#allocation2 + $0x170] sm:$0xff]   ;;  %v1503_v8 = vld [vmem:[#allocation2 + $0x178] sm:$0xff]  }
 0x332   :  { %v446_v11 = vrot.slane %v442_v9, %v1650_v45  ;;  %v448_v12 = vmul.f32 %v442_v9, %v435_v1  ;;  %v1496_v1 = vld [vmem:[#allocation2 + $0x140] sm:$0xff]  }
 0x334   :  { %v449_v13 = vsub.f32 %v421_v10, %v448_v12  ;;  %v447_v14 = vmul.f32 %v446_v11, %v414_v46 }
 0x336   :  { %v453_v15 = vrot.slane %v449_v13, %v1650_v45 }
 0x338   :  { %v454_v16 = vadd.f32 %v453_v15, %v447_v14 }
 0x33a   :  { %v455_v17 = vadd.f32 %v454_v16, %v1657_v55  ;;  %v1492_v55 = vld [vmem:[#allocation2 + $0x120] sm:$0xff]  }
 0x33b   :  { %1379 = vmatpush3.bf16.msra.mxu0 %v1492_v55 }
 0x33c   :  { %v456_v18 = vmax.f32 %v455_v17, 0.0  ;;  %1380 = vmatprep.subr.bf16.mxu0 %v1585_v0 }
 0x33e   :  { %v457_v19 = vpack.c.bf16 %v456_v18, %v456_v18 }
 0x33f   :  { %1381 = vmatpush3.bf16.msra.mxu0 %v1493_v24 }
 0x340   :  { %1367 = vmatmul.mubr.bf16.vlgmr.msra.gmra.mrb[4].mxu1 %v457_v19  ;;  %1382 = vmatprep.subr.bf16.mxu0 %v1585_v0 }
 0x341   :  { %1406 = vmatprep.mubr.msk.bf16.mxu1 %vm1586_vm0, %v1585_v0  ;;  %1391 = vmatpush3.bf16.msra.mxu1 %v1496_v1 }
 0x342   :  { %1392 = vmatprep.subr.bf16.mxu1 %v1585_v0 }
 0x343   :  { %1383 = vmatpush3.bf16.msra.mxu0 %v1494_v25 }
 0x344   :  { %1384 = vmatprep.subr.bf16.mxu0 %v1585_v0 }
 0x345   :  { %1393 = vmatpush3.bf16.msra.mxu1 %v1497_v2 }
 0x346   :  { %1394 = vmatprep.subr.bf16.mxu1 %v1585_v0 }
 0x347   :  { %1385 = vmatpush3.bf16.msra.mxu0 %v1495_v26 }
 0x348   :  { %1410 = vmatprep.subr.bf16.mxu0 %v1585_v0 }
 0x349   :  { %1395 = vmatpush3.bf16.msra.mxu1 %v1498_v3 }
 0x34a   :  { %1396 = vmatprep.subr.bf16.mxu1 %v1585_v0 }
 0x34d   :  { %1397 = vmatpush3.bf16.msra.mxu1 %v1499_v4 }
 0x34e   :  { %1398 = vmatprep.subr.bf16.mxu1 %v1585_v0 }
 0x351   :  { %1399 = vmatpush3.bf16.msra.mxu1 %v1500_v5 }
 0x352   :  { %1400 = vmatprep.subr.bf16.mxu1 %v1585_v0 }
 0x355   :  { %1401 = vmatpush3.bf16.msra.mxu1 %v1501_v6 }
 0x356   :  { %1402 = vmatprep.subr.bf16.mxu1 %v1585_v0 }
 0x359   :  { %1403 = vmatpush3.bf16.msra.mxu1 %v1502_v7 }
 0x35a   :  { %1404 = vmatprep.subr.bf16.mxu1 %v1585_v0 }
 0x35d   :  { %1405 = vmatpush3.bf16.msra.mxu1 %v1503_v8 }
 0x35e   :  { %1430 = vmatprep.subr.bf16.mxu1 %v1585_v0 }
 0x413   :  { %v557_v27 = vpop.f32.mrb[4].mxu1 }
 0x414   :  { %v565_v28 = vrot.slane %v557_v27, 4  ;;  %v571_v29 = vmul.f32 %v557_v27, %v557_v27  ;;  %v1368_v30 = vpop.f32.mrb[5].mxu1 }
 0x415   :  { %v560_v31 = vpop.f32.mrb[6].mxu1 }
 0x416   :  { %v566_v32 = vadd.f32 %v565_v28, %v557_v27  ;;  %v572_v33 = vrot.slane %v571_v29, 4  ;;  %v1369_v34 = vpop.f32.mrb[7].mxu1  ;;  %v705_v31 = vld [vmem:[%s1788_s2 + $0x8] sm:$0x1] }
 0x417   :  { %v706_v34 = vld [vmem:[%s1788_s2 + $0x9] sm:$0x1] }
 0x418   :  { %v567_v35 = vrot.slane %v566_v32, 2  ;;  %v573_v36 = vadd.f32 %v572_v33, %v571_v29 }
 0x41a   :  { %v568_v37 = vadd.f32 %v567_v35, %v566_v32  ;;  %v574_v38 = vrot.slane %v573_v36, 2 }
 0x41c   :  { %v569_v39 = vrot.slane %v568_v37, 1  ;;  %v575_v40 = vadd.f32 %v574_v38, %v573_v36 }
 0x41e   :  { %v570_v41 = vadd.f32 %v569_v39, %v568_v37  ;;  %v576_v42 = vrot.slane %v575_v40, 1 }
 0x420   :  { %v577_v43 = vadd.f32 %v576_v42, %v575_v40  ;;  %v578_v44 = vmul.f32 0.125, %v570_v41 }
 0x422   :  { %v579_v46 = vmul.f32 0.125, %v577_v43  ;;  %v580_v47 = vmul.f32 %v578_v44, %v578_v44  ;;  %v1504_v43 = vld [vmem:[#allocation2 + $0x180] sm:$0xff]  }
 0x424   :  { %v581_v48 = vsub.f32 %v579_v46, %v580_v47  ;;  %v1506_v46 = vld [vmem:[#allocation2 + $0x190] sm:$0xff]   ;;  %v1507_v47 = vld [vmem:[#allocation2 + $0x198] sm:$0xff]  }
 0x426   :  { %v582_v49 = vmax.f32 %v581_v48, 0.0  ;;  %v1508_v48 = vld [vmem:[#allocation2 + $0x1a0] sm:$0xff]  }
 0x428   :  { %v583_v50 = vadd.f32 1e-05, %v582_v49  ;;  %v1509_v49 = vld [vmem:[#allocation2 + $0x1a8] sm:$0xff]  }
 0x42a   :  { %1526 = vrsqrt.f32 %v583_v50  ;;  %v1510_v50 = vld [vmem:[#allocation2 + $0x1b0] sm:$0xff]  }
 0x434   :  { %v1527_v52 = vpop.eup %1526 }
 0x435   :  { %v585_v53 = vmul.f32 %v1527_v52, %v563_v51  ;;  %v1511_v51 = vld [vmem:[#allocation2 + $0x1b8] sm:$0xff]  }
 0x437   :  { %v589_v56 = vrot.slane %v585_v53, %v1650_v45  ;;  %v591_v57 = vmul.f32 %v585_v53, %v578_v44  ;;  %v1505_v44 = vld [vmem:[#allocation2 + $0x188] sm:$0xff]  }
 0x439   :  { %v592_v58 = vsub.f32 %v564_v54, %v591_v57  ;;  %v590_v59 = vmul.f32 %v589_v56, %v557_v27 }
 0x43b   :  { %v596_v60 = vrot.slane %v592_v58, %v1650_v45 }
 0x43d   :  { %v597_v61 = vadd.f32 %v596_v60, %v590_v59 }
 0x43f   :  { %v1716_v62 = vmax.f32 %v597_v61, 0.0 }
 0x441   :  { %v599_v63 = vpack.c.bf16 %v1716_v62, %v1716_v62 }
 0x443   :  { %1387 = vmatmul.mubr.bf16.vlgmr.msra.gmra.mrb[8].mxu0 %v599_v63 }
 0x444   :  { %1426 = vmatprep.mubr.msk.bf16.mxu0 %vm1586_vm0, %v1585_v0  ;;  %1411 = vmatpush3.bf16.msra.mxu0 %v1504_v43 }
 0x445   :  { %1412 = vmatprep.subr.bf16.mxu0 %v1585_v0 }
 0x448   :  { %1413 = vmatpush3.bf16.msra.mxu0 %v1505_v44 }
 0x449   :  { %1414 = vmatprep.subr.bf16.mxu0 %v1585_v0 }
 0x44c   :  { %1415 = vmatpush3.bf16.msra.mxu0 %v1506_v46 }
 0x44d   :  { %1416 = vmatprep.subr.bf16.mxu0 %v1585_v0 }
 0x450   :  { %1417 = vmatpush3.bf16.msra.mxu0 %v1507_v47 }
 0x451   :  { %1418 = vmatprep.subr.bf16.mxu0 %v1585_v0 }
 0x454   :  { %1419 = vmatpush3.bf16.msra.mxu0 %v1508_v48 }
 0x455   :  { %1420 = vmatprep.subr.bf16.mxu0 %v1585_v0 }
 0x458   :  { %1421 = vmatpush3.bf16.msra.mxu0 %v1509_v49 }
 0x459   :  { %1422 = vmatprep.subr.bf16.mxu0 %v1585_v0 }
 0x45c   :  { %1423 = vmatpush3.bf16.msra.mxu0 %v1510_v50 }
 0x45d   :  { %1424 = vmatprep.subr.bf16.mxu0 %v1585_v0 }
 0x460   :  { %1425 = vmatpush3.bf16.msra.mxu0 %v1511_v51 }
 0x516   :  { %v699_v9 = vpop.f32.mrb[8].mxu0 }
 0x517   :  { %v707_v10 = vrot.slane %v699_v9, 4  ;;  %v713_v11 = vmul.f32 %v699_v9, %v699_v9  ;;  %v1388_v12 = vpop.f32.mrb[9].mxu0 }
 0x518   :  { %v702_v13 = vpop.f32.mrb[10].mxu0 }
 0x519   :  { %v708_v14 = vadd.f32 %v707_v10, %v699_v9  ;;  %v714_v15 = vrot.slane %v713_v11, 4  ;;  %v1389_v16 = vpop.f32.mrb[11].mxu0 }
 0x51b   :  { %v709_v17 = vrot.slane %v708_v14, 2  ;;  %v715_v18 = vadd.f32 %v714_v15, %v713_v11 }
 0x51d   :  { %v710_v19 = vadd.f32 %v709_v17, %v708_v14  ;;  %v716_v20 = vrot.slane %v715_v18, 2  ;;  %v847_v14 = vld [vmem:[%s1788_s2 + $0xa] sm:$0x1]  ;;  %v848_v17 = vld [vmem:[%s1788_s2 + $0xb] sm:$0x1] }
 0x51f   :  { %v711_v21 = vrot.slane %v710_v19, 1  ;;  %v717_v22 = vadd.f32 %v716_v20, %v715_v18 }
 0x521   :  { %v712_v23 = vadd.f32 %v711_v21, %v710_v19  ;;  %v718_v55 = vrot.slane %v717_v22, 1 }
 0x523   :  { %v719_v24 = vadd.f32 %v718_v55, %v717_v22  ;;  %v720_v25 = vmul.f32 0.125, %v712_v23 }
 0x525   :  { %v721_v26 = vmul.f32 0.125, %v719_v24  ;;  %v722_v27 = vmul.f32 %v720_v25, %v720_v25 }
 0x527   :  { %v723_v28 = vsub.f32 %v721_v26, %v722_v27  ;;  %v1512_v26 = vld [vmem:[#allocation2 + $0x1c0] sm:$0xff]   ;;  %v1513_v27 = vld [vmem:[#allocation2 + $0x1c8] sm:$0xff]  }
 0x529   :  { %v724_v29 = vmax.f32 %v723_v28, 0.0  ;;  %v1514_v28 = vld [vmem:[#allocation2 + $0x1d0] sm:$0xff]  }
 0x52b   :  { %v725_v30 = vadd.f32 1e-05, %v724_v29  ;;  %v1515_v29 = vld [vmem:[#allocation2 + $0x1d8] sm:$0xff]  }
 0x52d   :  { %1528 = vrsqrt.f32 %v725_v30  ;;  %v1517_v30 = vld [vmem:[#allocation2 + $0x1e8] sm:$0xff]  }
 0x537   :  { %v1529_v32 = vpop.eup %1528 }
 0x538   :  { %v727_v33 = vmul.f32 %v1529_v32, %v705_v31  ;;  %v1518_v31 = vld [vmem:[#allocation2 + $0x1f0] sm:$0xff]   ;;  %v1519_v32 = vld [vmem:[#allocation2 + $0x1f8] sm:$0xff]  }
 0x53a   :  { %v731_v35 = vrot.slane %v727_v33, %v1650_v45  ;;  %v733_v36 = vmul.f32 %v727_v33, %v720_v25 }
 0x53c   :  { %v734_v37 = vsub.f32 %v706_v34, %v733_v36  ;;  %v732_v38 = vmul.f32 %v731_v35, %v699_v9 }
 0x53e   :  { %v738_v39 = vrot.slane %v734_v37, %v1650_v45 }
 0x540   :  { %v739_v40 = vadd.f32 %v738_v39, %v732_v38 }
 0x542   :  { %v740_v41 = vmax.f32 %v739_v40, 0.0 }
 0x544   :  { %v741_v42 = vpack.c.bf16 %v740_v41, %v740_v41 }
 0x546   :  { %1407 = vmatmul.mubr.bf16.vlgmr.msra.gmra.mrb[8].mxu1 %v741_v42 }
 0x547   :  { %1446 = vmatprep.mubr.msk.bf16.mxu1 %vm1586_vm0, %v1585_v0  ;;  %1431 = vmatpush3.bf16.msra.mxu1 %v1512_v26 }
 0x548   :  { %1432 = vmatprep.subr.bf16.mxu1 %v1585_v0 }
 0x54b   :  { %1433 = vmatpush3.bf16.msra.mxu1 %v1513_v27 }
 0x54c   :  { %1434 = vmatprep.subr.bf16.mxu1 %v1585_v0 }
 0x54f   :  { %1435 = vmatpush3.bf16.msra.mxu1 %v1514_v28 }
 0x550   :  { %1436 = vmatprep.subr.bf16.mxu1 %v1585_v0 }
 0x553   :  { %1437 = vmatpush3.bf16.msra.mxu1 %v1515_v29 }
 0x554   :  { %1438 = vmatprep.subr.bf16.mxu1 %v1585_v0 }
 0x619   :  { %v841_v52 = vpop.f32.mrb[8].mxu1 }
 0x61a   :  { %v849_v53 = vrot.slane %v841_v52, 4  ;;  %v855_v54 = vmul.f32 %v841_v52, %v841_v52  ;;  %v1408_v56 = vpop.f32.mrb[9].mxu1 }
 0x61b   :  { %v844_v57 = vpop.f32.mrb[10].mxu1 }
 0x61c   :  { %v850_v58 = vadd.f32 %v849_v53, %v841_v52  ;;  %v856_v59 = vrot.slane %v855_v54, 4  ;;  %v1409_v60 = vpop.f32.mrb[11].mxu1  ;;  %v990_v57 = vld [vmem:[%s1788_s2 + $0xc] sm:$0x1] }
 0x61d   :  { %v991_v60 = vld [vmem:[%s1788_s2 + $0xd] sm:$0x1] }
 0x61e   :  { %v851_v61 = vrot.slane %v850_v58, 2  ;;  %v857_v63 = vadd.f32 %v856_v59, %v855_v54 }
 0x620   :  { %v852_v1 = vadd.f32 %v851_v61, %v850_v58  ;;  %v858_v2 = vrot.slane %v857_v63, 2 }
 0x622   :  { %v853_v3 = vrot.slane %v852_v1, 1  ;;  %v859_v4 = vadd.f32 %v858_v2, %v857_v63 }
 0x624   :  { %v854_v5 = vadd.f32 %v853_v3, %v852_v1  ;;  %v860_v6 = vrot.slane %v859_v4, 1 }
 0x626   :  { %v861_v7 = vadd.f32 %v860_v6, %v859_v4  ;;  %v862_v8 = vmul.f32 0.125, %v854_v5 }
 0x628   :  { %v863_v9 = vmul.f32 0.125, %v861_v7  ;;  %v864_v10 = vmul.f32 %v862_v8, %v862_v8  ;;  %v1209_v7 = vld [vmem:[%s1788_s2 + $0xe] ss:$0 sm:$0xff] }
 0x62a   :  { %v865_v11 = vsub.f32 %v863_v9, %v864_v10 }
 0x62c   :  { %v866_v12 = vmax.f32 %v865_v11, 0.0 }
 0x62e   :  { %v867_v13 = vadd.f32 1e-05, %v866_v12 }
 0x630   :  { %1530 = vrsqrt.f32 %v867_v13 }
 0x63a   :  { %v1531_v15 = vpop.eup %1530 }
 0x63b   :  { %v869_v16 = vmul.f32 %v1531_v15, %v847_v14 }
 0x63d   :  { %v873_v18 = vrot.slane %v869_v16, %v1650_v45  ;;  %v875_v19 = vmul.f32 %v869_v16, %v862_v8 }
 0x63f   :  { %v876_v20 = vsub.f32 %v848_v17, %v875_v19  ;;  %v874_v21 = vmul.f32 %v873_v18, %v841_v52 }
 0x641   :  { %v880_v22 = vrot.slane %v876_v20, %v1650_v45 }
 0x643   :  { %v881_v23 = vadd.f32 %v880_v22, %v874_v21 }
 0x645   :  { %v882_v55 = vadd.f32 %v881_v23, %v1716_v62  ;;  %v1516_v62 = vld [vmem:[#allocation2 + $0x1e0] sm:$0xff]  }
 0x646   :  { %1439 = vmatpush3.bf16.msra.mxu1 %v1516_v62 }
 0x647   :  { %v883_v24 = vmax.f32 %v882_v55, 0.0  ;;  %1440 = vmatprep.subr.bf16.mxu1 %v1585_v0 }
 0x649   :  { %v884_v25 = vpack.c.bf16 %v883_v24, %v883_v24 }
 0x64a   :  { %1441 = vmatpush3.bf16.msra.mxu1 %v1517_v30 }
 0x64b   :  { %1427 = vmatmul.mubr.bf16.vlgmr.msra.gmra.mrb[12].mxu0 %v884_v25  ;;  %1442 = vmatprep.subr.bf16.mxu1 %v1585_v0 }
 0x64e   :  { %1443 = vmatpush3.bf16.msra.mxu1 %v1518_v31 }
 0x64f   :  { %1444 = vmatprep.subr.bf16.mxu1 %v1585_v0 }
 0x652   :  { %1445 = vmatpush3.bf16.msra.mxu1 %v1519_v32 }
 0x71e   :  { %v984_v33 = vpop.f32.mrb[12].mxu0 }
 0x71f   :  { %v992_v34 = vrot.slane %v984_v33, 4  ;;  %v998_v35 = vmul.f32 %v984_v33, %v984_v33  ;;  %v1428_v36 = vpop.f32.mrb[13].mxu0 }
 0x720   :  { %v987_v37 = vpop.f32.mrb[14].mxu0 }
 0x721   :  { %v993_v38 = vadd.f32 %v992_v34, %v984_v33  ;;  %v999_v39 = vrot.slane %v998_v35, 4  ;;  %v1429_v40 = vpop.f32.mrb[15].mxu0 }
 0x723   :  { %v994_v41 = vrot.slane %v993_v38, 2  ;;  %v1000_v42 = vadd.f32 %v999_v39, %v998_v35 }
 0x725   :  { %v995_v43 = vadd.f32 %v994_v41, %v993_v38  ;;  %v1001_v44 = vrot.slane %v1000_v42, 2 }
 0x727   :  { %v996_v46 = vrot.slane %v995_v43, 1  ;;  %v1002_v47 = vadd.f32 %v1001_v44, %v1000_v42 }
 0x729   :  { %v997_v48 = vadd.f32 %v996_v46, %v995_v43  ;;  %v1003_v49 = vrot.slane %v1002_v47, 1 }
 0x72b   :  { %v1004_v50 = vadd.f32 %v1003_v49, %v1002_v47  ;;  %v1005_v0 = vmul.f32 0.125, %v997_v48 }
 0x72d   :  { %v1006_v51 = vmul.f32 0.125, %v1004_v50  ;;  %v1007_v52 = vmul.f32 %v1005_v0, %v1005_v0 }
 0x72f   :  { %v1008_v53 = vsub.f32 %v1006_v51, %v1007_v52 }
 0x731   :  { %v1009_v54 = vmax.f32 %v1008_v53, 0.0 }
 0x733   :  { %v1010_v56 = vadd.f32 1e-05, %v1009_v54 }
 0x735   :  { %1532 = vrsqrt.f32 %v1010_v56 }
 0x73f   :  { %v1533_v58 = vpop.eup %1532 }
 0x740   :  { %v1012_v59 = vmul.f32 %v1533_v58, %v990_v57 }
 0x742   :  { %v1016_v61 = vrot.slane %v1012_v59, %v1650_v45  ;;  %v1018_v63 = vmul.f32 %v1012_v59, %v1005_v0 }
 0x744   :  { %v1019_v1 = vsub.f32 %v991_v60, %v1018_v63  ;;  %v1017_v2 = vmul.f32 %v1016_v61, %v984_v33 }
 0x746   :  { %v1023_v3 = vrot.slane %v1019_v1, %v1650_v45 }
 0x748   :  { %v1024_v4 = vadd.f32 %v1023_v3, %v1017_v2 }
 0x74a   :  { %v1025_v5 = vmax.f32 %v1024_v4, 0.0 }
 0x74c   :  { %v1027_v6 = vpack.c.bf16 %v1025_v5, %v1025_v5 }
 0x74e   :  { %1447 = vmatmul.mubr.bf16.vlgmr.msra.gmra.mrb[12].mxu1 %v1027_v6 }
 0x821   :  { %v1131_v8 = vpop.f32.mrb[12].mxu1 }
 0x822   :  { %v1132_v9 = vadd.f32 %v1209_v7, %v1131_v8  ;;  %v1448_v10 = vpop.f32.mrb[13].mxu1 }
 0x823   :  { %v1134_v11 = vpop.f32.mrb[14].mxu1 }
 0x824   :  { %1137 = vst [vmem:[#allocation5] sm:$0xff] %v1132_v9  ;;  %v1449_v12 = vpop.f32.mrb[15].mxu1 }
 0x825   :  { %1567 = shalt.err (!%p1564_p12)
}
 0x826   :  { %s1568_s2 = scalar_lea.hbm %s1789_s3, 128 }
 0x827   :  { %p1569_p13 = scmp.ne.s32.totalorder %s1789_s3, %s1568_s2  ;;  %p1572_p0 = scmp.lt.u32.totalorder %s1568_s2, %s1789_s3 }
 0x829   :  { %p1574_p1 = pnand %p1572_p0, %p1569_p13 }
 0x82b   :  { %1577 = shalt.err (!%p1574_p1)
}
 0x82c   :  { %1147 = dma.vmem_to_hbm [thread:$0]  %s1145_s28, 128, %s1789_s3, [#allocation4]  }
 0x82d   :  { %1580 = dma.done.wait [#allocation4], 128  }
 0x82e   :  { %1581 = vsyncadd [#allocation4], 4294967168 }
 0x82f   :  { %1151 = vsyncpa [#allocation3], 1 }
 0x830   :  { %1152 = vsyncpa [#allocation4], 1 }

</bundles_post_ra>
